<compile_context>
chip_gen: v5e
topology: v5e:2x2
jax: 0.10.0
libtpu: 0.0.40
codegen_flags: <defaults>
</compile_context>

<pallas_src>
import functools

import jax
import jax.numpy as jnp
from jax.experimental import pallas as pl
from jax.experimental.pallas import tpu as pltpu

_LANE = 128  # lane width; pad feature dims to multiples of this


def _round_up(x, m):
    return ((x + m - 1) // m) * m


# ----------------------------------------------------------------------------
# Fused kernel
# ----------------------------------------------------------------------------
def _make_fused_mlp_kernel(num_layers, fold_bias):
    """kernel(x_ref, w0, [b0], w1, [b1], ..., o_ref, h_scratch)."""
    n_per_layer = 1 if fold_bias else 2

    def kernel(x_ref, *rest):
        wb_refs = rest[: num_layers * n_per_layer]
        o_ref = rest[num_layers * n_per_layer]
        h_scr = rest[num_layers * n_per_layer + 1]

        h = x_ref[...]                                        # (TM, K0p) f32
        for l in range(num_layers):
            w = wb_refs[n_per_layer * l][...]                 # (Klp, Nlp)
            lhs = h if h.dtype == w.dtype else h.astype(w.dtype)   # bf16 path
            h = jnp.dot(lhs, w, preferred_element_type=jnp.float32)
            if not fold_bias:
                h = h + wb_refs[n_per_layer * l + 1][...]     # (1, Nlp) f32
            h = jnp.maximum(h, 0.0)                           # ReLU after EVERY layer
            if l < num_layers - 1:
                # Stage the inter-layer activation through VMEM scratch so the
                # (TM, Nlp) value does not stay live in vregs across layers
                # (avoids spill-bound regime at TM=512).
                npad = h.shape[1]
                h_scr[:, :npad] = h
                h = h_scr[:, :npad]
        o_ref[...] = h.astype(o_ref.dtype)

    return kernel


# ----------------------------------------------------------------------------
# Parameter handling
# ----------------------------------------------------------------------------
def init_params(layer_sizes, key):
    """nn.Linear-style init.  Returns [(W (out,in), b (out,))] PyTorch layout."""
    params = []
    for i in range(len(layer_sizes) - 1):
        fan_in, fan_out = layer_sizes[i], layer_sizes[i + 1]
        key, kw, kb = jax.random.split(key, 3)
        bound = 1.0 / jnp.sqrt(fan_in)
        W = jax.random.uniform(kw, (fan_out, fan_in), jnp.float32, -bound, bound)
        b = jax.random.uniform(kb, (fan_out,), jnp.float32, -bound, bound)
        params.append((W, b))
    return params


def prepare_params(params, use_bf16=False):
    """One-time: transpose to (in, out), zero-pad feature dims to 128, and
    (when possible) fold biases into the padded weight matrices.

    Returns (prepared, out_features, fold_bias) where prepared is a list of
    (W_t_padded,) tuples if biases were folded, else (W_t_padded, b_padded).
    """
    num_layers = len(params)
    fan_ins = [W.shape[1] for (W, _) in params]
    # Bias folding needs a spare padding lane at every layer's input.
    fold_bias = all(f % _LANE != 0 for f in fan_ins)
    wdtype = jnp.bfloat16 if use_bf16 else jnp.float32

    prepared = []
    for l, (W, b) in enumerate(params):
        fan_out, fan_in = W.shape
        Kp = _round_up(fan_in, _LANE)
        Np = _round_up(fan_out, _LANE)
        A = jnp.zeros((Kp, Np), jnp.float32).at[:fan_in, :fan_out].set(W.T)
        if fold_bias:
            A = A.at[fan_in, :fan_out].set(b)        # bias row on the 1-channel
            if l < num_layers - 1:
                A = A.at[fan_in, fan_out].set(1.0)   # 1-channel passthrough
            prepared.append((A.astype(wdtype),))
        else:
            b_p = jnp.zeros((1, Np), jnp.float32).at[0, :fan_out].set(b)
            prepared.append((A.astype(wdtype), b_p))
    out_features = params[-1][0].shape[0]
    return prepared, out_features, fold_bias


# ----------------------------------------------------------------------------
# Forward (single fused pallas_call)
# ----------------------------------------------------------------------------
@functools.partial(jax.jit, static_argnums=(2, 3))
def neuralnet3_forward(x, prepared, out_features, fold_bias):
    B, K0 = x.shape
    L = len(prepared)

    K0p = prepared[0][0].shape[0]
    Np_out = prepared[-1][0].shape[1]
    max_np = max(layer[0].shape[1] for layer in prepared)

    # Row tiling:
    #  - small batches: one sublane-aligned tile (grid of 1; fixed overhead only)
    #  - large batches: tiles up to 512 rows, but always >= 2 grid steps so the
    #    "parallel" grid axis can shard across v7x's two TensorCores.
    if B <= 128:
        TM = _round_up(B, 8)
    else:
        TM = min(512, _round_up(-(-B // 2), 8))
    Bp = _round_up(B, TM)

    if fold_bias:
        # Padded input with the constant-1 bias channel in the first pad lane.
        x_p = jnp.zeros((Bp, K0p), jnp.float32).at[:B, :K0].set(x).at[:B, K0].set(1.0)
    elif (Bp != B) or (K0p != K0):
        x_p = jnp.zeros((Bp, K0p), jnp.float32).at[:B, :K0].set(x)
    else:
        x_p = x  # already aligned: no host-side pad copy at all

    in_specs = [pl.BlockSpec((TM, K0p), lambda i: (i, 0))]
    operands = [x_p]
    for layer in prepared:
        W_t = layer[0]
        Kp, Np = W_t.shape
        in_specs.append(pl.BlockSpec((Kp, Np), lambda i: (0, 0)))
        operands.append(W_t)
        if not fold_bias:
            in_specs.append(pl.BlockSpec((1, Np), lambda i: (0, 0)))
            operands.append(layer[1])

    out_p = pl.pallas_call(
        _make_fused_mlp_kernel(L, fold_bias),
        out_shape=jax.ShapeDtypeStruct((Bp, Np_out), jnp.float32),
        grid=(Bp // TM,),
        in_specs=in_specs,
        out_specs=pl.BlockSpec((TM, Np_out), lambda i: (i, 0)),
        scratch_shapes=[pltpu.VMEM((TM, max_np), jnp.float32)],
        compiler_params=pltpu.CompilerParams(
            dimension_semantics=("parallel",)),
    )(*operands)

    return out_p[:B, :out_features]


# ----------------------------------------------------------------------------
# Pure-JAX reference (PyTorch-layout params)
# ----------------------------------------------------------------------------
def neuralnet3_ref(x, params):
    res = x
    for (W, b) in params:
        res = jnp.maximum(res @ W.T + b, 0.0)   # ReLU after every layer (PyTorch quirk)
    return res


if __name__ == "__main__":
    key = jax.random.PRNGKey(0)
    layer_sizes = [32, 64, 48, 16]   # LayerSizes argument of NeuralNet3

    kx, kx2, kp = jax.random.split(key, 3)
    params = init_params(layer_sizes, kp)

    # One-time param prep (transpose + lane padding + bias folding).
    prepared, out_features, fold_bias = prepare_params(params, use_bf16=False)

    # Small batch (single tile, grid of 1).
    batch = 8
    x = jax.random.normal(kx, (batch, layer_sizes[0]), jnp.float32)
    out = jax.block_until_ready(neuralnet3_forward(x, prepared, out_features, fold_bias))
    ref = neuralnet3_ref(x, params)
    assert out.shape == (batch, layer_sizes[-1])
    assert jnp.allclose(out, ref, atol=1e-5, rtol=1e-5), "mismatch vs reference (B=8)"

    # Larger batch: exercises multi-step grid (>=2 steps -> both TCs on v7x),
    # row padding, and bias folding across tiles.
    batch2 = 200
    x2 = jax.random.normal(kx2, (batch2, layer_sizes[0]), jnp.float32)
    out2 = jax.block_until_ready(neuralnet3_forward(x2, prepared, out_features, fold_bias))
    ref2 = neuralnet3_ref(x2, params)
    assert out2.shape == (batch2, layer_sizes[-1])
    assert jnp.allclose(out2, ref2, atol=1e-5, rtol=1e-5), "mismatch vs reference (B=200)"

    print("KERNEL_OK")
</pallas_src>

<mosaic_0001>
module attributes {stable_mosaic.version = 11 : i64} {
  func.func @kernel(%arg0: i32, %arg1: memref<8x128xf32, #tpu.memory_space<vmem>>, %arg2: memref<128x128xf32, #tpu.memory_space<vmem>>, %arg3: memref<128x128xf32, #tpu.memory_space<vmem>>, %arg4: memref<128x128xf32, #tpu.memory_space<vmem>>, %arg5: memref<8x128xf32, #tpu.memory_space<vmem>>, %arg6: memref<8x128xf32, #tpu.memory_space<vmem>>) attributes {dimension_semantics = [#tpu.dimension_semantics<parallel>], iteration_bounds = array<i64: 1>, scalar_prefetch = 0 : i64, scratch_operands = 1 : i64, tpu.core_type = #tpu.core_type<tc>, window_params = [{transform_indices = @transform_0, window_bounds = array<i64: 8, 128>}, {pipeline_mode = #tpu.pipeline_mode<synchronous>, transform_indices = @transform_1, window_bounds = array<i64: 128, 128>}, {pipeline_mode = #tpu.pipeline_mode<synchronous>, transform_indices = @transform_2, window_bounds = array<i64: 128, 128>}, {pipeline_mode = #tpu.pipeline_mode<synchronous>, transform_indices = @transform_3, window_bounds = array<i64: 128, 128>}, {transform_indices = @transform_4, window_bounds = array<i64: 8, 128>}]} {
    %c0 = arith.constant 0 : index
    %c0_0 = arith.constant 0 : index
    %0 = vector.load %arg1[%c0, %c0_0] : memref<8x128xf32, #tpu.memory_space<vmem>>, vector<8x128xf32>
    %c0_1 = arith.constant 0 : index
    %c0_2 = arith.constant 0 : index
    %1 = vector.load %arg2[%c0_1, %c0_2] : memref<128x128xf32, #tpu.memory_space<vmem>>, vector<128x128xf32>
    %cst = arith.constant dense<0.000000e+00> : vector<8x128xf32>
    %2 = tpu.matmul %0, %1, %cst {dimension_numbers = #tpu.dot_dimension_numbers<[1], [0], [0], [1], [0, 0, 1, 1], [], []>} : vector<8x128xf32>, vector<128x128xf32>, vector<8x128xf32> -> vector<8x128xf32>
    %cst_3 = arith.constant 0.000000e+00 : f32
    %3 = vector.broadcast %cst_3 : f32 to vector<8x128xf32>
    %4 = arith.maximumf %2, %3 : vector<8x128xf32>
    %c0_4 = arith.constant 0 : index
    %c0_5 = arith.constant 0 : index
    %5 = vector.load %arg6[%c0_4, %c0_5] : memref<8x128xf32, #tpu.memory_space<vmem>>, vector<8x128xf32>
    tpu.vector_store %arg6[%c0_4, %c0_5], %4 {strides = array<i32>} : memref<8x128xf32, #tpu.memory_space<vmem>>, vector<8x128xf32>,
    %c0_6 = arith.constant 0 : index
    %c0_7 = arith.constant 0 : index
    %6 = vector.load %arg6[%c0_6, %c0_7] : memref<8x128xf32, #tpu.memory_space<vmem>>, vector<8x128xf32>
    %c0_8 = arith.constant 0 : index
    %c0_9 = arith.constant 0 : index
    %7 = vector.load %arg3[%c0_8, %c0_9] : memref<128x128xf32, #tpu.memory_space<vmem>>, vector<128x128xf32>
    %cst_10 = arith.constant dense<0.000000e+00> : vector<8x128xf32>
    %8 = tpu.matmul %6, %7, %cst_10 {dimension_numbers = #tpu.dot_dimension_numbers<[1], [0], [0], [1], [0, 0, 1, 1], [], []>} : vector<8x128xf32>, vector<128x128xf32>, vector<8x128xf32> -> vector<8x128xf32>
    %cst_11 = arith.constant 0.000000e+00 : f32
    %9 = vector.broadcast %cst_11 : f32 to vector<8x128xf32>
    %10 = arith.maximumf %8, %9 : vector<8x128xf32>
    %c0_12 = arith.constant 0 : index
    %c0_13 = arith.constant 0 : index
    %11 = vector.load %arg6[%c0_12, %c0_13] : memref<8x128xf32, #tpu.memory_space<vmem>>, vector<8x128xf32>
    tpu.vector_store %arg6[%c0_12, %c0_13], %10 {strides = array<i32>} : memref<8x128xf32, #tpu.memory_space<vmem>>, vector<8x128xf32>,
    %c0_14 = arith.constant 0 : index
    %c0_15 = arith.constant 0 : index
    %12 = vector.load %arg6[%c0_14, %c0_15] : memref<8x128xf32, #tpu.memory_space<vmem>>, vector<8x128xf32>
    %c0_16 = arith.constant 0 : index
    %c0_17 = arith.constant 0 : index
    %13 = vector.load %arg4[%c0_16, %c0_17] : memref<128x128xf32, #tpu.memory_space<vmem>>, vector<128x128xf32>
    %cst_18 = arith.constant dense<0.000000e+00> : vector<8x128xf32>
    %14 = tpu.matmul %12, %13, %cst_18 {dimension_numbers = #tpu.dot_dimension_numbers<[1], [0], [0], [1], [0, 0, 1, 1], [], []>} : vector<8x128xf32>, vector<128x128xf32>, vector<8x128xf32> -> vector<8x128xf32>
    %cst_19 = arith.constant 0.000000e+00 : f32
    %15 = vector.broadcast %cst_19 : f32 to vector<8x128xf32>
    %16 = arith.maximumf %14, %15 : vector<8x128xf32>
    %c0_20 = arith.constant 0 : index
    %c0_21 = arith.constant 0 : index
    %17 = vector.load %arg5[%c0_20, %c0_21] : memref<8x128xf32, #tpu.memory_space<vmem>>, vector<8x128xf32>
    tpu.vector_store %arg5[%c0_20, %c0_21], %16 {strides = array<i32>} : memref<8x128xf32, #tpu.memory_space<vmem>>, vector<8x128xf32>,
    return
  }
  func.func @transform_0(%arg0: i32) -> (i32, i32) {
    %c0_i32 = arith.constant 0 : i32
    %c0_i32_0 = arith.constant 0 : i32
    return %arg0, %c0_i32 : i32, i32
  }
  func.func @transform_1(%arg0: i32) -> (i32, i32) {
    %c0_i32 = arith.constant 0 : i32
    %c0_i32_0 = arith.constant 0 : i32
    %c0_i32_1 = arith.constant 0 : i32
    return %c0_i32, %c0_i32_0 : i32, i32
  }
  func.func @transform_2(%arg0: i32) -> (i32, i32) {
    %c0_i32 = arith.constant 0 : i32
    %c0_i32_0 = arith.constant 0 : i32
    %c0_i32_1 = arith.constant 0 : i32
    return %c0_i32, %c0_i32_0 : i32, i32
  }
  func.func @transform_3(%arg0: i32) -> (i32, i32) {
    %c0_i32 = arith.constant 0 : i32
    %c0_i32_0 = arith.constant 0 : i32
    %c0_i32_1 = arith.constant 0 : i32
    return %c0_i32, %c0_i32_0 : i32, i32
  }
  func.func @transform_4(%arg0: i32) -> (i32, i32) {
    %c0_i32 = arith.constant 0 : i32
    %c0_i32_0 = arith.constant 0 : i32
    return %arg0, %c0_i32 : i32, i32
  }
}

</mosaic_0001>

<bundles_post_ra>
// kernel: neuralnet3_forward.1
= control target key start
LH: loop header
LB: loop body
LE: loop exit
PB: predicated region body
PF: predicated region fallthrough
CT: control target
= control target key end

     0   :  { %9 = vsyncpa [#allocation4], 0  ;;  %s354_s0 = inlined_call_operand.vmem [shape: f32[8,128], index: 0, kind: input, shape index: {}]   ;;  %s355_s1 = inlined_call_operand.hbm [shape: f32[128,128], index: 1, kind: input, shape index: {}]   ;;  %s356_s2 = inlined_call_operand.hbm [shape: f32[128,128], index: 2, kind: input, shape index: {}]   ;;  %s357_s3 = inlined_call_operand.hbm [shape: f32[128,128], index: 3, kind: input, shape index: {}]   ;;  %s358_s4 = inlined_call_operand.hbm [shape: f32[8,128], index: 4, kind: output, shape index: {}]  }
   0x1   :  { %10 = vsyncpa [#allocation7], 0 }
   0x2   :  { %11 = vsyncpa [#allocation5], 0  ;;  %s31_s17 = sshll.u32 %s356_s2, 4  ;;  %s308_s18 = smov [#allocation6]   ;;  %s32_s17 = int_to_ptr.hbm [resolvable:$true] %s31_s17 }
   0x3   :  { %s33_s19 = sshll.u32 %s308_s18, 4  ;;  %s18_s22 = sshll.u32 %s355_s1, 4  ;;  %s34_s19 = int_to_ptr.vmem [resolvable:$true] %s33_s19  ;;  %s19_s22 = int_to_ptr.hbm [resolvable:$true] %s18_s22 }
   0x4   :  { %s309_s23 = smov 128   ;;  %s310_s24 = smov 8  }
   0x5   :  { %39 = dma.hbm_to_vmem [thread:$0]  %s32_s17, 2048, %s34_s19, [#allocation7], %s309_s23, %s309_s23, %s310_s24  }
   0x6   :  { %s311_s25 = smov [#allocation3]   ;;  %s44_s29 = sshll.u32 %s357_s3, 4  ;;  %s45_s29 = int_to_ptr.hbm [resolvable:$true] %s44_s29 }
   0x7   :  { %s20_s26 = sshll.u32 %s311_s25, 4  ;;  %s312_s2 = smov [#allocation8]   ;;  %s21_s26 = int_to_ptr.vmem [resolvable:$true] %s20_s26 }
   0x8   :  { %26 = dma.hbm_to_vmem [thread:$0]  %s19_s22, 2048, %s21_s26, [#allocation4], %s309_s23, %s309_s23, %s310_s24  }
   0x9   :  { %s46_s30 = sshll.u32 %s312_s2, 4  ;;  %s47_s30 = int_to_ptr.vmem [resolvable:$true] %s46_s30 }
   0xa   :  { %52 = dma.hbm_to_vmem [thread:$0]  %s45_s29, 2048, %s47_s30, [#allocation7], %s309_s23, %s309_s23, %s310_s24  }
   0xb   :  { %302 = dma.done.wait [#allocation4], 2048  }
   0xc   :  { %303 = vsyncadd [#allocation4], 4294965248 }
   0xd   :  { %304 = dma.done.wait [#allocation7], 4096  }
   0xe   :  { %305 = vsyncadd [#allocation7], 4294963200  ;;  %v81_v0 = vld [vmem:[#allocation3 + $0x78] sm:$0xff]  ;;  %v80_v1 = vld [vmem:[#allocation3 + $0x70] sm:$0xff]  ;;  %s189_s8 = sshll.u32 %s358_s4, 4  ;;  %s190_s8 = int_to_ptr.hbm [resolvable:$true] %s189_s8 }
   0xf   :  { %82 = vmatpush.msra.mxu0 %v81_v0  ;;  %v79_v2 = vld [vmem:[#allocation3 + $0x68] sm:$0xff]  ;;  %v78_v3 = vld [vmem:[#allocation3 + $0x60] sm:$0xff]  ;;  %v120_v4 = vld [vmem:[#allocation6 + $0x78] sm:$0xff] }
  0x10   :  { %v77_v5 = vld [vmem:[#allocation3 + $0x58] sm:$0xff]  ;;  %121 = vmatpush.msra.mxu1 %v120_v4  ;;  %v119_v6 = vld [vmem:[#allocation6 + $0x70] sm:$0xff]  ;;  %v118_v7 = vld [vmem:[#allocation6 + $0x68] sm:$0xff] }
  0x11   :  { %83 = vmatpush.msra.mxu0 %v80_v1  ;;  %v76_v8 = vld [vmem:[#allocation3 + $0x50] sm:$0xff]  ;;  %v117_v9 = vld [vmem:[#allocation6 + $0x60] sm:$0xff]  ;;  %v75_v10 = vld [vmem:[#allocation3 + $0x48] sm:$0xff] }
  0x12   :  { %122 = vmatpush.msra.mxu1 %v119_v6  ;;  %v116_v11 = vld [vmem:[#allocation6 + $0x58] sm:$0xff]  ;;  %v74_v12 = vld [vmem:[#allocation3 + $0x40] sm:$0xff]  ;;  %v115_v13 = vld [vmem:[#allocation6 + $0x50] sm:$0xff] }
  0x13   :  { %84 = vmatpush.msra.mxu0 %v79_v2  ;;  %v73_v14 = vld [vmem:[#allocation3 + $0x38] sm:$0xff]  ;;  %v114_v15 = vld [vmem:[#allocation6 + $0x48] sm:$0xff]  ;;  %v72_v16 = vld [vmem:[#allocation3 + $0x30] sm:$0xff] }
  0x14   :  { %123 = vmatpush.msra.mxu1 %v118_v7  ;;  %v113_v17 = vld [vmem:[#allocation6 + $0x40] sm:$0xff]  ;;  %v71_v18 = vld [vmem:[#allocation3 + $0x28] sm:$0xff]  ;;  %v112_v19 = vld [vmem:[#allocation6 + $0x38] sm:$0xff] }
  0x15   :  { %85 = vmatpush.msra.mxu0 %v78_v3  ;;  %v70_v20 = vld [vmem:[#allocation3 + $0x20] sm:$0xff]  ;;  %v111_v21 = vld [vmem:[#allocation6 + $0x30] sm:$0xff]  ;;  %v69_v22 = vld [vmem:[#allocation3 + $0x18] sm:$0xff] }
  0x16   :  { %124 = vmatpush.msra.mxu1 %v117_v9  ;;  %v110_v23 = vld [vmem:[#allocation6 + $0x28] sm:$0xff]  ;;  %v68_v24 = vld [vmem:[#allocation3 + $0x10] sm:$0xff]  ;;  %v109_v25 = vld [vmem:[#allocation6 + $0x20] sm:$0xff] }
  0x17   :  { %86 = vmatpush.msra.mxu0 %v77_v5  ;;  %v67_v26 = vld [vmem:[#allocation3 + $0x8] sm:$0xff]  ;;  %v108_v27 = vld [vmem:[#allocation6 + $0x18] sm:$0xff]  ;;  %v66_v28 = vld [vmem:[#allocation3] sm:$0xff] }
  0x18   :  { %125 = vmatpush.msra.mxu1 %v116_v11  ;;  %v65_v29 = vld [vmem:[%s354_s0] sm:$0xff]  ;;  %v107_v30 = vld [vmem:[#allocation6 + $0x10] sm:$0xff]  ;;  %v106_v31 = vld [vmem:[#allocation6 + $0x8] sm:$0xff]  ;;  %s313_s0 = smov [#allocation9]  }
  0x19   :  { %87 = vmatpush.msra.mxu0 %v76_v8  ;;  %v105_v32 = vld [vmem:[#allocation6] sm:$0xff]  ;;  %v159_v33 = vld [vmem:[#allocation8 + $0x78] sm:$0xff]  ;;  %v158_v34 = vld [vmem:[#allocation8 + $0x70] sm:$0xff]  ;;  %s187_s5 = sshll.u32 %s313_s0, 4  ;;  %s188_s5 = int_to_ptr.vmem [resolvable:$true] %s187_s5 }
  0x1a   :  { %126 = vmatpush.msra.mxu1 %v115_v13  ;;  %160 = vmatpush.msra.mxu2 %v159_v33  ;;  %v157_v35 = vld [vmem:[#allocation8 + $0x68] sm:$0xff]  ;;  %v156_v36 = vld [vmem:[#allocation8 + $0x60] sm:$0xff]  ;;  %v155_v37 = vld [vmem:[#allocation8 + $0x58] sm:$0xff] }
  0x1b   :  { %88 = vmatpush.msra.mxu0 %v75_v10  ;;  %v154_v38 = vld [vmem:[#allocation8 + $0x50] sm:$0xff]  ;;  %v153_v39 = vld [vmem:[#allocation8 + $0x48] sm:$0xff]  ;;  %v152_v40 = vld [vmem:[#allocation8 + $0x40] sm:$0xff] }
  0x1c   :  { %127 = vmatpush.msra.mxu1 %v114_v15  ;;  %161 = vmatpush.msra.mxu2 %v158_v34  ;;  %v151_v41 = vld [vmem:[#allocation8 + $0x38] sm:$0xff]  ;;  %v150_v42 = vld [vmem:[#allocation8 + $0x30] sm:$0xff]  ;;  %v149_v43 = vld [vmem:[#allocation8 + $0x28] sm:$0xff] }
  0x1d   :  { %89 = vmatpush.msra.mxu0 %v74_v12  ;;  %v148_v44 = vld [vmem:[#allocation8 + $0x20] sm:$0xff]  ;;  %v147_v45 = vld [vmem:[#allocation8 + $0x18] sm:$0xff]  ;;  %v146_v46 = vld [vmem:[#allocation8 + $0x10] sm:$0xff] }
  0x1e   :  { %128 = vmatpush.msra.mxu1 %v113_v17  ;;  %162 = vmatpush.msra.mxu2 %v157_v35  ;;  %v145_v49 = vld [vmem:[#allocation8 + $0x8] sm:$0xff]  ;;  %v144_v50 = vld [vmem:[#allocation8] sm:$0xff] }
  0x1f   :  { %90 = vmatpush.msra.mxu0 %v73_v14 }
  0x20   :  { %129 = vmatpush.msra.mxu1 %v112_v19  ;;  %163 = vmatpush.msra.mxu2 %v156_v36 }
  0x21   :  { %91 = vmatpush.msra.mxu0 %v72_v16 }
  0x22   :  { %130 = vmatpush.msra.mxu1 %v111_v21  ;;  %164 = vmatpush.msra.mxu2 %v155_v37 }
  0x23   :  { %92 = vmatpush.msra.mxu0 %v71_v18 }
  0x24   :  { %131 = vmatpush.msra.mxu1 %v110_v23  ;;  %165 = vmatpush.msra.mxu2 %v154_v38 }
  0x25   :  { %93 = vmatpush.msra.mxu0 %v70_v20 }
  0x26   :  { %132 = vmatpush.msra.mxu1 %v109_v25  ;;  %166 = vmatpush.msra.mxu2 %v153_v39 }
  0x27   :  { %94 = vmatpush.msra.mxu0 %v69_v22 }
  0x28   :  { %133 = vmatpush.msra.mxu1 %v108_v27  ;;  %167 = vmatpush.msra.mxu2 %v152_v40 }
  0x29   :  { %95 = vmatpush.msra.mxu0 %v68_v24 }
  0x2a   :  { %134 = vmatpush.msra.mxu1 %v107_v30  ;;  %168 = vmatpush.msra.mxu2 %v151_v41 }
  0x2b   :  { %96 = vmatpush.msra.mxu0 %v67_v26 }
  0x2c   :  { %135 = vmatpush.msra.mxu1 %v106_v31  ;;  %169 = vmatpush.msra.mxu2 %v150_v42 }
  0x2d   :  { %97 = vmatpush.msra.mxu0 %v66_v28 }
  0x2e   :  { %98 = vmatmul.f32.vlgmr.msra.gmra.mxu0 %v65_v29  ;;  %136 = vmatpush.msra.mxu1 %v105_v32 }
  0x2f   :  { %170 = vmatpush.msra.mxu2 %v149_v43 }
  0x31   :  { %171 = vmatpush.msra.mxu2 %v148_v44 }
  0x33   :  { %172 = vmatpush.msra.mxu2 %v147_v45 }
  0x35   :  { %173 = vmatpush.msra.mxu2 %v146_v46 }
  0x37   :  { %174 = vmatpush.msra.mxu2 %v145_v49 }
  0x39   :  { %175 = vmatpush.msra.mxu2 %v144_v50 }
  0xab   :  { %v99_v47 = vpop.f32.mrf.mxu0 }
  0xac   :  { %v102_v48 = vmax.f32 %v99_v47, 0.0 }
  0xae   :  { %137 = vmatmul.f32.vlgmr.msra.gmra.mxu1 %v102_v48 }
 0x12b   :  { %v138_v51 = vpop.f32.mrf.mxu1 }
 0x12c   :  { %v141_v52 = vmax.f32 %v138_v51, 0.0 }
 0x12e   :  { %176 = vmatmul.f32.vlgmr.msra.gmra.mxu2 %v141_v52 }
 0x1b1   :  { %v177_v53 = vpop.f32.mrf.mxu2 }
 0x1b2   :  { %v180_v54 = vmax.f32 %v177_v53, 0.0 }
 0x1b4   :  { %181 = vst [vmem:[#allocation9] sm:$0xff] %v180_v54 }
 0x1b5   :  { %192 = dma.vmem_to_hbm [thread:$0]  %s188_s5, 128, %s190_s8, [#allocation5]  }
 0x1b6   :  { %306 = dma.done.wait [#allocation5], 128  }
 0x1b7   :  { %307 = vsyncadd [#allocation5], 4294967168 }
 0x1b8   :  { %197 = vsyncpa [#allocation4], 1 }
 0x1b9   :  { %198 = vsyncpa [#allocation7], 1 }
 0x1ba   :  { %199 = vsyncpa [#allocation5], 1 }

</bundles_post_ra>
